<compile_context>
chip_gen: v5e
topology: v5e:2x2
jax: 0.10.0
libtpu: 0.0.40
codegen_flags: <defaults>
</compile_context>

<pallas_src>
import functools

import jax
import jax.numpy as jnp
from jax import lax
from jax.experimental import pallas as pl
from jax.experimental.pallas import tpu as pltpu

_LANES = 128
_SUBLANES = 8


def _round_up(a, b):
    return ((a + b - 1) // b) * b


def _dice_kernel(x_ref, t_ref, inter_ref, st_ref, *,
                 tile_rows, sub_rows, blocks_per_split, full_blocks,
                 rows_in_partial, need_mask):
    """Accumulate per-split partial sums of sigmoid(x)*t and sigmoid(x)+t.

    Grid = (num_splits, blocks_per_split). Axis 0 is "parallel" (one split per
    TensorCore on v7x); axis 1 streams blocks of the flattened input. Outputs
    are per-split (8,128) vector accumulators; the final cross-lane reduce and
    the dice formula run in the JAX wrapper.
    """
    p = pl.program_id(0)
    i = pl.program_id(1)
    n_chunks = tile_rows // sub_rows

    @pl.when(i == 0)
    def _():
        inter_ref[...] = jnp.zeros_like(inter_ref)
        st_ref[...] = jnp.zeros_like(st_ref)

    def fold(a):
        # (sub_rows, 128) -> (sub_rows//8, 8, 128), reduce the chunk axis only:
        # pure VPU vreg adds; no cross-lane/sublane reduction in the hot loop.
        return jnp.sum(a.reshape(sub_rows // _SUBLANES, _SUBLANES, _LANES),
                       axis=0)

    def accumulate(mask_fn):
        def body(c, carry):
            inter, st = carry
            r0 = pl.multiple_of(c * sub_rows, sub_rows)
            x = x_ref[pl.ds(r0, sub_rows), :].astype(jnp.float32)
            t = t_ref[pl.ds(r0, sub_rows), :].astype(jnp.float32)
            # sigmoid = 1 / (1 + exp(-x)): exp and the approximate reciprocal
            # both land on the EUP slot, keeping VALU pressure minimal.
            s = pl.reciprocal(1.0 + jnp.exp(-x), approx=True)
            s, t = mask_fn(c, s, t)
            return inter + fold(s * t), st + fold(s + t)

        zeros = jnp.zeros((_SUBLANES, _LANES), jnp.float32)
        inter, st = lax.fori_loop(0, n_chunks, body, (zeros, zeros))
        inter_ref[0] += inter
        st_ref[0] += st

    def no_mask(c, s, t):
        return s, t

    if not need_mask:
        # Every grid block is completely covered by valid rows: no mask code
        # is generated at all (Python-static decision).
        accumulate(no_mask)
    else:
        block_idx = p * blocks_per_split + i

        def masked(c, s, t):
            # Row-granular validity (every existing row has all 128 lanes
            # valid): only block_idx == full_blocks is partially valid with
            # `rows_in_partial` rows; later blocks are entirely out of bounds.
            row = lax.broadcasted_iota(jnp.int32, s.shape, 0) + c * sub_rows
            valid = jnp.logical_and(block_idx == full_blocks,
                                    row < rows_in_partial)
            zero = jnp.zeros_like(s)
            return jnp.where(valid, s, zero), jnp.where(valid, t, zero)

        @pl.when(block_idx < full_blocks)
        def _():
            accumulate(no_mask)

        @pl.when(block_idx >= full_blocks)
        def _():
            accumulate(masked)


def dice_loss(inputs, targets, smooth=1.0, *,
              tile_rows=8192, sub_rows=512, num_splits=2):
    """Pallas implementation of DiceLoss.forward (returns a scalar f32).

    Inputs/targets may be f32 / bf16 / int8 / etc.: they stream in their
    native dtype and are upcast to f32 per chunk inside the kernel.
    """
    smooth = float(smooth)
    x = jnp.reshape(inputs, (-1,))
    t = jnp.reshape(targets, (-1,))
    n = x.shape[0]

    # Lane-aligned main part handled by the kernel; <128-element tail handled
    # by a tiny jnp epilogue (no full-tensor pad copy).
    n_main = (n // _LANES) * _LANES
    rows = n_main // _LANES

    if rows == 0:
        # Tiny input: no kernel launch needed.
        s = jax.nn.sigmoid(x.astype(jnp.float32))
        tf = t.astype(jnp.float32)
        inter = jnp.sum(s * tf)
        total = jnp.sum(s + tf)
        union = total - inter
        return 1.0 - (2.0 * inter + smooth) / (union + smooth)

    # Row multiple for clean sublane packing of narrow dtypes (8/16/32 for
    # 4/2/1-byte elements).
    def _rm(dt):
        return max(_SUBLANES, 32 // jnp.dtype(dt).itemsize)
    row_mult = max(_rm(x.dtype), _rm(t.dtype))

    # Tiling: large DMA blocks (tr rows), compute sub-chunks (sub rows).
    sub = min(int(sub_rows), _round_up(rows, row_mult))
    sub = max(row_mult, (sub // row_mult) * row_mult)
    tr = min(int(tile_rows), _round_up(rows, sub))
    tr = max(sub, _round_up(tr, sub))

    nblocks = pl.cdiv(rows, tr)
    ns = max(1, int(num_splits))
    bps = pl.cdiv(nblocks, ns)
    total_blocks = ns * bps
    full_blocks = rows // tr
    rows_in_partial = rows - full_blocks * tr
    need_mask = total_blocks != full_blocks

    if n_main == n:
        xm, tm = x, t                     # reshape below is a pure bitcast
    else:
        xm, tm = x[:n_main], t[:n_main]   # prefix slice only when unaligned
    x2 = xm.reshape(rows, _LANES)
    t2 = tm.reshape(rows, _LANES)

    # Scoped-VMEM budget: 2 inputs x 2 pipeline buffers x block bytes + slack
    # for compute temporaries / outputs. Safe on v5e/v6e (128 MiB) and v7x (64).
    io_bytes = 2 * tr * _LANES * (x.dtype.itemsize + t.dtype.itemsize)
    vmem_limit = int(min(96 * 2 ** 20, max(32 * 2 ** 20, io_bytes + 24 * 2 ** 20)))

    kernel = functools.partial(
        _dice_kernel, tile_rows=tr, sub_rows=sub, blocks_per_split=bps,
        full_blocks=full_blocks, rows_in_partial=rows_in_partial,
        need_mask=need_mask)

    inter_parts, st_parts = pl.pallas_call(
        kernel,
        out_shape=(
            jax.ShapeDtypeStruct((ns, _SUBLANES, _LANES), jnp.float32),
            jax.ShapeDtypeStruct((ns, _SUBLANES, _LANES), jnp.float32),
        ),
        grid_spec=pltpu.PrefetchScalarGridSpec(
            num_scalar_prefetch=0,
            grid=(ns, bps),
            in_specs=[
                pl.BlockSpec((tr, _LANES), lambda p, i: (p * bps + i, 0)),
                pl.BlockSpec((tr, _LANES), lambda p, i: (p * bps + i, 0)),
            ],
            out_specs=[
                pl.BlockSpec((1, _SUBLANES, _LANES), lambda p, i: (p, 0, 0)),
                pl.BlockSpec((1, _SUBLANES, _LANES), lambda p, i: (p, 0, 0)),
            ],
        ),
        compiler_params=pltpu.CompilerParams(
            dimension_semantics=("parallel", "arbitrary"),
            vmem_limit_bytes=vmem_limit,
        ),
    )(x2, t2)

    inter = jnp.sum(inter_parts)
    total = jnp.sum(st_parts)

    if n_main != n:
        # <128-element tail contribution, computed directly in jnp.
        xt = x[n_main:].astype(jnp.float32)
        tt = t[n_main:].astype(jnp.float32)
        st = jax.nn.sigmoid(xt)
        inter = inter + jnp.sum(st * tt)
        total = total + jnp.sum(st + tt)

    union = total - inter
    return 1.0 - (2.0 * inter + smooth) / (union + smooth)


def _dice_loss_ref(inputs, targets, smooth=1.0):
    s = jax.nn.sigmoid(inputs.astype(jnp.float32)).reshape(-1)
    t = targets.astype(jnp.float32).reshape(-1)
    inter = jnp.sum(s * t)
    total = jnp.sum(s + t)
    union = total - inter
    return 1.0 - (2.0 * inter + smooth) / (union + smooth)


if __name__ == "__main__":
    key = jax.random.PRNGKey(0)
    k1, k2 = jax.random.split(key)

    # NCHW logits + binary targets, consistent with a segmentation head.
    x = jax.random.normal(k1, (2, 4, 16, 16), dtype=jnp.float32)
    tgt = (jax.random.uniform(k2, (2, 4, 16, 16)) > 0.5).astype(jnp.float32)

    out = jax.block_until_ready(dice_loss(x, tgt, smooth=1.0))
    ref = _dice_loss_ref(x, tgt, smooth=1.0)
    assert jnp.allclose(out, ref, atol=2e-3, rtol=2e-3), (out, ref)

    # Non-lane-aligned size: exercises the masked final block + jnp tail path.
    k3, k4 = jax.random.split(k1)
    x2 = jax.random.normal(k3, (3, 5, 7, 11), dtype=jnp.float32)
    t2 = (jax.random.uniform(k4, (3, 5, 7, 11)) > 0.5).astype(jnp.float32)
    out2 = jax.block_until_ready(dice_loss(x2, t2, smooth=1.0))
    ref2 = _dice_loss_ref(x2, t2, smooth=1.0)
    assert jnp.allclose(out2, ref2, atol=2e-3, rtol=2e-3), (out2, ref2)

    # bf16 logits streamed in native dtype (HBM-bound -> ~2x less traffic).
    xb = x.astype(jnp.bfloat16)
    out3 = jax.block_until_ready(dice_loss(xb, tgt, smooth=1.0))
    ref3 = _dice_loss_ref(xb.astype(jnp.float32), tgt, smooth=1.0)
    assert jnp.allclose(out3, ref3, atol=2e-3, rtol=2e-3), (out3, ref3)

    print("KERNEL_OK")
</pallas_src>

<mosaic_0001>
module attributes {stable_mosaic.version = 11 : i64} {
  func.func @_dice_kernel(%arg0: i32, %arg1: i32, %arg2: memref<16x128xf32, #tpu.memory_space<vmem>>, %arg3: memref<16x128xf32, #tpu.memory_space<vmem>>, %arg4: memref<1x8x128xf32, #tpu.memory_space<vmem>>, %arg5: memref<1x8x128xf32, #tpu.memory_space<vmem>>) attributes {dimension_semantics = [#tpu.dimension_semantics<parallel>, #tpu.dimension_semantics<arbitrary>], iteration_bounds = array<i64: 2, 1>, scalar_prefetch = 0 : i64, scratch_operands = 0 : i64, tpu.core_type = #tpu.core_type<tc>, window_params = [{transform_indices = @transform_0, window_bounds = array<i64: 16, 128>}, {transform_indices = @transform_1, window_bounds = array<i64: 16, 128>}, {transform_indices = @transform_2, window_bounds = array<i64: 1, 8, 128>}, {transform_indices = @transform_3, window_bounds = array<i64: 1, 8, 128>}]} {
    %c0_i32 = arith.constant 0 : i32
    %0 = arith.cmpi eq, %arg1, %c0_i32 : i32
    %1 = arith.extui %0 : i1 to i32
    %c0_i32_0 = arith.constant 0 : i32
    %2 = arith.cmpi ne, %1, %c0_i32_0 : i32
    scf.if %2 {
      %cst = arith.constant 0.000000e+00 : f32
      %11 = vector.broadcast %cst : f32 to vector<1x8x128xf32>
      %c0 = arith.constant 0 : index
      %c0_5 = arith.constant 0 : index
      %c0_6 = arith.constant 0 : index
      %12 = vector.load %arg4[%c0, %c0_5, %c0_6] : memref<1x8x128xf32, #tpu.memory_space<vmem>>, vector<1x8x128xf32>
      tpu.vector_store %arg4[%c0, %c0_5, %c0_6], %11 {strides = array<i32>} : memref<1x8x128xf32, #tpu.memory_space<vmem>>, vector<1x8x128xf32>,
      %cst_7 = arith.constant 0.000000e+00 : f32
      %13 = vector.broadcast %cst_7 : f32 to vector<1x8x128xf32>
      %c0_8 = arith.constant 0 : index
      %c0_9 = arith.constant 0 : index
      %c0_10 = arith.constant 0 : index
      %14 = vector.load %arg5[%c0_8, %c0_9, %c0_10] : memref<1x8x128xf32, #tpu.memory_space<vmem>>, vector<1x8x128xf32>
      tpu.vector_store %arg5[%c0_8, %c0_9, %c0_10], %13 {strides = array<i32>} : memref<1x8x128xf32, #tpu.memory_space<vmem>>, vector<1x8x128xf32>,
    } else {
    }
    %c1_i32 = arith.constant 1 : i32
    %3 = arith.muli %arg0, %c1_i32 : i32
    %4 = arith.addi %3, %arg1 : i32
    %c1_i32_1 = arith.constant 1 : i32
    %5 = arith.cmpi slt, %4, %c1_i32_1 : i32
    %6 = arith.extui %5 : i1 to i32
    %c0_i32_2 = arith.constant 0 : i32
    %7 = arith.cmpi ne, %6, %c0_i32_2 : i32
    scf.if %7 {
      %cst = arith.constant 0.000000e+00 : f32
      %11 = vector.broadcast %cst : f32 to vector<8x128xf32>
      %c0_i32_5 = arith.constant 0 : i32
      %c16_i32 = arith.constant 16 : i32
      %12 = arith.muli %c0_i32_5, %c16_i32 : i32
      %13 = tpu.assume_multiple %12, 16 : i32
      %14 = arith.index_cast %13 : i32 to index
      %c0 = arith.constant 0 : index
      %15 = vector.load %arg2[%14, %c0] : memref<16x128xf32, #tpu.memory_space<vmem>>, vector<16x128xf32>
      %16 = arith.index_cast %13 : i32 to index
      %c0_6 = arith.constant 0 : index
      %17 = vector.load %arg3[%16, %c0_6] : memref<16x128xf32, #tpu.memory_space<vmem>>, vector<16x128xf32>
      %cst_7 = arith.constant 0.000000e+00 : f32
      %18 = vector.broadcast %cst_7 : f32 to vector<16x128xf32>
      %19 = arith.subf %18, %15 : vector<16x128xf32>
      %20 = math.exp %19 : vector<16x128xf32>
      %cst_8 = arith.constant 1.000000e+00 : f32
      %21 = vector.broadcast %cst_8 : f32 to vector<16x128xf32>
      %22 = arith.addf %21, %20 : vector<16x128xf32>
      %23 = tpu.reciprocal %22 {approx = true} : vector<16x128xf32> -> vector<16x128xf32>
      %24 = arith.mulf %23, %17 : vector<16x128xf32>
      %25 = vector.shape_cast %24 : vector<16x128xf32> to vector<2x8x128xf32>
      %cst_9 = arith.constant dense<0.000000e+00> : vector<8x128xf32>
      %26 = vector.multi_reduction <add>, %25, %cst_9 [0] : vector<2x8x128xf32> to vector<8x128xf32>
      %27 = arith.addf %11, %26 : vector<8x128xf32>
      %28 = arith.addf %23, %17 : vector<16x128xf32>
      %29 = vector.shape_cast %28 : vector<16x128xf32> to vector<2x8x128xf32>
      %cst_10 = arith.constant dense<0.000000e+00> : vector<8x128xf32>
      %30 = vector.multi_reduction <add>, %29, %cst_10 [0] : vector<2x8x128xf32> to vector<8x128xf32>
      %31 = arith.addf %11, %30 : vector<8x128xf32>
      %c1_i32_11 = arith.constant 1 : i32
      %c0_12 = arith.constant 0 : index
      %c0_13 = arith.constant 0 : index
      %c0_14 = arith.constant 0 : index
      %32 = vector.load %arg4[%c0_12, %c0_13, %c0_14] : memref<1x8x128xf32, #tpu.memory_space<vmem>>, vector<1x8x128xf32>
      %33 = vector.shape_cast %32 : vector<1x8x128xf32> to vector<8x128xf32>
      %34 = arith.addf %33, %27 : vector<8x128xf32>
      %c0_15 = arith.constant 0 : index
      %c0_16 = arith.constant 0 : index
      %c0_17 = arith.constant 0 : index
      %35 = vector.load %arg4[%c0_15, %c0_16, %c0_17] : memref<1x8x128xf32, #tpu.memory_space<vmem>>, vector<1x8x128xf32>
      %36 = vector.shape_cast %35 : vector<1x8x128xf32> to vector<8x128xf32>
      %37 = vector.shape_cast %34 : vector<8x128xf32> to vector<1x8x128xf32>
      tpu.vector_store %arg4[%c0_15, %c0_16, %c0_17], %37 {strides = array<i32>} : memref<1x8x128xf32, #tpu.memory_space<vmem>>, vector<1x8x128xf32>,
      %c0_18 = arith.constant 0 : index
      %c0_19 = arith.constant 0 : index
      %c0_20 = arith.constant 0 : index
      %38 = vector.load %arg5[%c0_18, %c0_19, %c0_20] : memref<1x8x128xf32, #tpu.memory_space<vmem>>, vector<1x8x128xf32>
      %39 = vector.shape_cast %38 : vector<1x8x128xf32> to vector<8x128xf32>
      %40 = arith.addf %39, %31 : vector<8x128xf32>
      %c0_21 = arith.constant 0 : index
      %c0_22 = arith.constant 0 : index
      %c0_23 = arith.constant 0 : index
      %41 = vector.load %arg5[%c0_21, %c0_22, %c0_23] : memref<1x8x128xf32, #tpu.memory_space<vmem>>, vector<1x8x128xf32>
      %42 = vector.shape_cast %41 : vector<1x8x128xf32> to vector<8x128xf32>
      %43 = vector.shape_cast %40 : vector<8x128xf32> to vector<1x8x128xf32>
      tpu.vector_store %arg5[%c0_21, %c0_22, %c0_23], %43 {strides = array<i32>} : memref<1x8x128xf32, #tpu.memory_space<vmem>>, vector<1x8x128xf32>,
    } else {
    }
    %c1_i32_3 = arith.constant 1 : i32
    %8 = arith.cmpi sge, %4, %c1_i32_3 : i32
    %9 = arith.extui %8 : i1 to i32
    %c0_i32_4 = arith.constant 0 : i32
    %10 = arith.cmpi ne, %9, %c0_i32_4 : i32
    scf.if %10 {
      %cst = arith.constant 0.000000e+00 : f32
      %11 = vector.broadcast %cst : f32 to vector<8x128xf32>
      %c0_i32_5 = arith.constant 0 : i32
      %c16_i32 = arith.constant 16 : i32
      %12 = arith.muli %c0_i32_5, %c16_i32 : i32
      %13 = tpu.assume_multiple %12, 16 : i32
      %14 = arith.index_cast %13 : i32 to index
      %c0 = arith.constant 0 : index
      %15 = vector.load %arg2[%14, %c0] : memref<16x128xf32, #tpu.memory_space<vmem>>, vector<16x128xf32>
      %16 = arith.index_cast %13 : i32 to index
      %c0_6 = arith.constant 0 : index
      %17 = vector.load %arg3[%16, %c0_6] : memref<16x128xf32, #tpu.memory_space<vmem>>, vector<16x128xf32>
      %cst_7 = arith.constant 0.000000e+00 : f32
      %18 = vector.broadcast %cst_7 : f32 to vector<16x128xf32>
      %19 = arith.subf %18, %15 : vector<16x128xf32>
      %20 = math.exp %19 : vector<16x128xf32>
      %cst_8 = arith.constant 1.000000e+00 : f32
      %21 = vector.broadcast %cst_8 : f32 to vector<16x128xf32>
      %22 = arith.addf %21, %20 : vector<16x128xf32>
      %23 = tpu.reciprocal %22 {approx = true} : vector<16x128xf32> -> vector<16x128xf32>
      %24 = tpu.iota {dimensions = array<i32: 0>} : vector<16x128xi32>
      %c16_i32_9 = arith.constant 16 : i32
      %25 = arith.muli %c0_i32_5, %c16_i32_9 : i32
      %26 = vector.broadcast %25 : i32 to vector<16x128xi32>
      %27 = arith.addi %24, %26 : vector<16x128xi32>
      %c1_i32_10 = arith.constant 1 : i32
      %28 = arith.cmpi eq, %4, %c1_i32_10 : i32
      %c0_i32_11 = arith.constant 0 : i32
      %29 = vector.broadcast %c0_i32_11 : i32 to vector<16x128xi32>
      %30 = arith.cmpi slt, %27, %29 : vector<16x128xi32>
      %31 = vector.broadcast %28 : i1 to vector<16x128xi1>
      %32 = arith.andi %31, %30 : vector<16x128xi1>
      %cst_12 = arith.constant 0.000000e+00 : f32
      %33 = vector.broadcast %cst_12 : f32 to vector<16x128xf32>
      %34 = arith.select %32, %23, %33 : vector<16x128xi1>, vector<16x128xf32>
      %35 = arith.select %32, %17, %33 : vector<16x128xi1>, vector<16x128xf32>
      %36 = arith.mulf %34, %35 : vector<16x128xf32>
      %37 = vector.shape_cast %36 : vector<16x128xf32> to vector<2x8x128xf32>
      %cst_13 = arith.constant dense<0.000000e+00> : vector<8x128xf32>
      %38 = vector.multi_reduction <add>, %37, %cst_13 [0] : vector<2x8x128xf32> to vector<8x128xf32>
      %39 = arith.addf %11, %38 : vector<8x128xf32>
      %40 = arith.addf %34, %35 : vector<16x128xf32>
      %41 = vector.shape_cast %40 : vector<16x128xf32> to vector<2x8x128xf32>
      %cst_14 = arith.constant dense<0.000000e+00> : vector<8x128xf32>
      %42 = vector.multi_reduction <add>, %41, %cst_14 [0] : vector<2x8x128xf32> to vector<8x128xf32>
      %43 = arith.addf %11, %42 : vector<8x128xf32>
      %c1_i32_15 = arith.constant 1 : i32
      %c0_16 = arith.constant 0 : index
      %c0_17 = arith.constant 0 : index
      %c0_18 = arith.constant 0 : index
      %44 = vector.load %arg4[%c0_16, %c0_17, %c0_18] : memref<1x8x128xf32, #tpu.memory_space<vmem>>, vector<1x8x128xf32>
      %45 = vector.shape_cast %44 : vector<1x8x128xf32> to vector<8x128xf32>
      %46 = arith.addf %45, %39 : vector<8x128xf32>
      %c0_19 = arith.constant 0 : index
      %c0_20 = arith.constant 0 : index
      %c0_21 = arith.constant 0 : index
      %47 = vector.load %arg4[%c0_19, %c0_20, %c0_21] : memref<1x8x128xf32, #tpu.memory_space<vmem>>, vector<1x8x128xf32>
      %48 = vector.shape_cast %47 : vector<1x8x128xf32> to vector<8x128xf32>
      %49 = vector.shape_cast %46 : vector<8x128xf32> to vector<1x8x128xf32>
      tpu.vector_store %arg4[%c0_19, %c0_20, %c0_21], %49 {strides = array<i32>} : memref<1x8x128xf32, #tpu.memory_space<vmem>>, vector<1x8x128xf32>,
      %c0_22 = arith.constant 0 : index
      %c0_23 = arith.constant 0 : index
      %c0_24 = arith.constant 0 : index
      %50 = vector.load %arg5[%c0_22, %c0_23, %c0_24] : memref<1x8x128xf32, #tpu.memory_space<vmem>>, vector<1x8x128xf32>
      %51 = vector.shape_cast %50 : vector<1x8x128xf32> to vector<8x128xf32>
      %52 = arith.addf %51, %43 : vector<8x128xf32>
      %c0_25 = arith.constant 0 : index
      %c0_26 = arith.constant 0 : index
      %c0_27 = arith.constant 0 : index
      %53 = vector.load %arg5[%c0_25, %c0_26, %c0_27] : memref<1x8x128xf32, #tpu.memory_space<vmem>>, vector<1x8x128xf32>
      %54 = vector.shape_cast %53 : vector<1x8x128xf32> to vector<8x128xf32>
      %55 = vector.shape_cast %52 : vector<8x128xf32> to vector<1x8x128xf32>
      tpu.vector_store %arg5[%c0_25, %c0_26, %c0_27], %55 {strides = array<i32>} : memref<1x8x128xf32, #tpu.memory_space<vmem>>, vector<1x8x128xf32>,
    } else {
    }
    return
  }
  func.func @transform_0(%arg0: i32, %arg1: i32) -> (i32, i32) {
    %c1_i32 = arith.constant 1 : i32
    %0 = arith.muli %arg0, %c1_i32 : i32
    %1 = arith.addi %0, %arg1 : i32
    %c0_i32 = arith.constant 0 : i32
    %c0_i32_0 = arith.constant 0 : i32
    return %1, %c0_i32 : i32, i32
  }
  func.func @transform_1(%arg0: i32, %arg1: i32) -> (i32, i32) {
    %c1_i32 = arith.constant 1 : i32
    %0 = arith.muli %arg0, %c1_i32 : i32
    %1 = arith.addi %0, %arg1 : i32
    %c0_i32 = arith.constant 0 : i32
    %c0_i32_0 = arith.constant 0 : i32
    return %1, %c0_i32 : i32, i32
  }
  func.func @transform_2(%arg0: i32, %arg1: i32) -> (i32, i32, i32) {
    %c0_i32 = arith.constant 0 : i32
    %c0_i32_0 = arith.constant 0 : i32
    %c0_i32_1 = arith.constant 0 : i32
    return %arg0, %c0_i32, %c0_i32_0 : i32, i32, i32
  }
  func.func @transform_3(%arg0: i32, %arg1: i32) -> (i32, i32, i32) {
    %c0_i32 = arith.constant 0 : i32
    %c0_i32_0 = arith.constant 0 : i32
    %c0_i32_1 = arith.constant 0 : i32
    return %arg0, %c0_i32, %c0_i32_0 : i32, i32, i32
  }
}

</mosaic_0001>

<bundles_post_ra>
// kernel: tpu_custom_call.1
= control target key start
LH: loop header
LB: loop body
LE: loop exit
PB: predicated region body
PF: predicated region fallthrough
CT: control target
= control target key end

     0   :  { %s1029_s0 = inlined_call_operand.hbm [shape: f32[16,128], index: 0, kind: input, shape index: {}]   ;;  %s1030_s1 = inlined_call_operand.hbm [shape: f32[16,128], index: 1, kind: input, shape index: {}]   ;;  %s1031_s2 = inlined_call_operand.hbm [shape: f32[2,8,128], index: 2, kind: output, shape index: {0}]   ;;  %s1032_s3 = inlined_call_operand.hbm [shape: f32[2,8,128], index: 3, kind: output, shape index: {1}]  }
   0x1   :  { %1034 = sst [smem:[#allocation15_spill]] %s1029_s0 }
   0x2   :  { %9 = vsyncpa [#allocation3], 0 }
   0x3   :  { %11 = vsyncpa [#allocation3 + $0x1], 0 }
   0x4   :  { %12 = vsyncpa [#allocation6], 0 }
   0x5   :  { %14 = vsyncpa [#allocation6 + $0x1], 0 }
   0x6   :  { %15 = vsyncpa [#allocation4], 0 }
   0x7   :  { %17 = vsyncpa [#allocation4 + $0x1], 0 }
   0x8   :  { %18 = vsyncpa [#allocation9], 0 }
   0x9   :  { %20 = vsyncpa [#allocation9 + $0x1], 0  ;;  %s834_s12 = smov 0   ;;  %s836_s13 = smov 0  }
   0xa   :  { %s838_s14 = smov 0   ;;  %s840_s15 = smov 0  }
   0xb   :  { %s842_s16 = smov 0   ;;  %s844_s17 = smov 0  }
   0xc LB: > { %s523_s18 = sadd.s32 4294967295, %s809_s17   ;;  %s524_s19 = sadd.s32 4294967294, %s809_s17   ;;  %s809_s17 = sphi %s844_s17, %s26_s17   ;;  %s805_s16 = sphi %s842_s16, %s1048_s16   ;;  %s801_s15 = sphi %s840_s15, %s1047_s15   ;;  %s797_s14 = sphi %s838_s14, %s1046_s14   ;;  %s793_s13 = sphi %s836_s13, %s1045_s13   ;;  %s789_s12 = sphi %s834_s12, %s1044_s12  }
   0xd   : > { %s38_s20 = sadd.s32 1, %s805_s16  ;;  %s47_s21 = sadd.s32 1, %s797_s14 }
   0xe   : > { %p40_p0 = scmp.ge.s32.totalorder %s38_s20, 2  ;;  %p54_p1 = scmp.ne.s32.totalorder %s797_s14, %s793_s13 }
   0xf   : > { %p55_p2 = scmp.eq.s32.totalorder %s809_s17, 0  ;;  %p60_p3 = scmp.ne.s32.totalorder %s793_s13, %s789_s12 }
  0x10   : > { %s1050_s20 = smov (%p40_p0, %s38_s20), 0  ;;  %p61_p5 = scmp.eq.s32.totalorder %s523_s18, 0 }
  0x11   : > { %1035 = sst [smem:[#allocation14_spill]] %s1050_s20  ;;  %p875_p4 = por %p55_p2, %p54_p1 }
  0x12   : > { %s44_s23 = ssub.s32 %s805_s16, %s1050_s20  ;;  %p112_p6 = scmp.eq.s32.totalorder %s523_s18, 1 }
  0x13   : > { %p45_p7 = scmp.eq.s32.totalorder %s44_s23, 0  ;;  %p881_p8 = por %p61_p5, %p60_p3 }
  0x14   : > { %p885_p9 = por %p112_p6, %p54_p1  ;;  %p118_p10 = scmp.eq.s32.totalorder %s524_s19, 1 }
  0x15   : > { %s890_s26 = scalar_select %p45_p7, %s797_s14, %s47_s21  }
  0x16   : > { %p892_p11 = por %p118_p10, %p60_p3  ;;  %p526_p12 = scmp.ge.s32.totalorder %s809_s17, 2 }
  0x17   : > { %p570_p13 = scmp.lt.s32.totalorder %s809_s17, 2  ;;  %s899_s28 = sand.u32 1, %s797_s14  }
  0x18   : > { %s527_s29 = sshll.u32 %s899_s28, 4  ;;  %s546_s30 = sshll.u32 %s805_s16, 4 }
  0x19   : > { %s1040_s0 = sld [smem:[#allocation15_spill]]  ;;  %s168_s7 = scalar_lea.vmem [#allocation2], %s527_s29 }
  0x1a   : > { %s177_s8 = sshll.u32 %s168_s7, 4  ;;  %p910_p0 = pnand %p570_p13, %p875_p4  ;;  %s178_s8 = int_to_ptr.vmem [resolvable:$true] %s177_s8 }
  0x1b   : > { %p533_p1 = scmp.ge.s32.totalorder %s809_s17, 1  ;;  %s165_s11 = scalar_lea.sflag [#allocation3], %s899_s28 }
  0x1c   : > { %p635_p3 = pneg %p910_p0 }
  0x1f   : > { %s174_s6 = scalar_lea.hbm %s1040_s0, %s546_s30  ;;  %s638_s23 = scalar_lea.hbm %s1040_s0, 16 }
  0x20   : > { %s175_s9 = sshll.u32 %s174_s6, 4  ;;  %s176_s9 = int_to_ptr.hbm [resolvable:$true] %s175_s9 }
  0x21   : > { %s631_s18 = sshra.s32 %s176_s9, 4  ;;  %s632_s18 = int_to_ptr.hbm [resolvable:$true] %s631_s18 }
  0x22   : > { %s633_s19 = scalar_lea.hbm %s632_s18, 16 }
  0x23   : > { %p634_p2 = scmp.ne.s32.totalorder %s632_s18, %s633_s19  ;;  %p640_p4 = scmp.lt.s32.totalorder %s638_s23, %s633_s19 }
  0x25   : > { %p636_p5 = pnand %p635_p3, %p634_p2 }
  0x27   : > { %p637_p6 = pneg %p636_p5 }
  0x29   : > { %p642_p7 = pnand %p640_p4, %p637_p6 }
  0x2b   : > { %645 = shalt.err (!%p642_p7)
}
  0x2c   : > { %s811_s4 = smov 128   ;;  %s812_s5 = smov 8  }
  0x2d   : > { %559 = dma.hbm_to_vmem [thread:$0]  (!%p910_p0), %s176_s9, 256, %s178_s8, %s165_s11, %s811_s4, %s811_s4, %s812_s5  }
  0x2e   : > { %p208_p10 = scmp.lt.s32.totalorder %s809_s17, 3  ;;  %s197_s18 = scalar_lea.hbm %s1030_s1, %s546_s30 }
  0x2f   : > { %s198_s21 = sshll.u32 %s197_s18, 4  ;;  %s191_s22 = scalar_lea.vmem [#allocation5], %s527_s29  ;;  %s199_s21 = int_to_ptr.hbm [resolvable:$true] %s198_s21 }
  0x30   : > { %p932_p13 = pnand %p533_p1, %p208_p10  ;;  %s200_s23 = sshll.u32 %s191_s22, 4  ;;  %s201_s23 = int_to_ptr.vmem [resolvable:$true] %s200_s23 }
  0x31   : > { %s188_s0 = scalar_lea.sflag [#allocation6], %s899_s28  ;;  %s661_s20 = sshra.s32 %s199_s21, 4  ;;  %s662_s20 = int_to_ptr.hbm [resolvable:$true] %s661_s20 }
  0x32   : > { %s663_s8 = scalar_lea.hbm %s662_s20, 16  ;;  %s668_s11 = scalar_lea.hbm %s1030_s1, 16 }
  0x33   : > { %p664_p2 = scmp.ne.s32.totalorder %s662_s20, %s663_s8  ;;  %p670_p1 = scmp.lt.s32.totalorder %s668_s11, %s663_s8 }
  0x35   : > { %p666_p5 = pnand %p664_p2, %p635_p3 }
  0x37   : > { %p667_p6 = pneg %p666_p5 }
  0x39   : > { %p672_p4 = pnand %p670_p1, %p667_p6 }
  0x3b   : > { %675 = shalt.err (!%p672_p4)
}
  0x3c   : > { %562 = dma.hbm_to_vmem [thread:$0]  (!%p910_p0), %s199_s21, 256, %s201_s23, %s188_s0, %s811_s4, %s811_s4, %s812_s5  }
  0x3d   : > { %212 = sbr.rel (%p932_p13) target bundleno = 135 (0x87), region = 28  ;;  %s950_s20 = sand.u32 (!%p932_p13), 1, %s793_s13  }
  0x3e   : > { %s534_s28 = sshll.u32 (!%p932_p13), %s950_s20, 4  ;;  %s215_s29 = scalar_lea.sflag (!%p932_p13), [#allocation3], %s950_s20 }
  0x3f   : > { %s218_s6 = scalar_lea.vmem (!%p932_p13), [#allocation2], %s534_s28 }
  0x42   : > { %772 = dma.done.wait (%p881_p8), %s215_s29, 256  }
  0x43   : > { %774 = vsyncadd (%p881_p8), %s215_s29, 4294967040  ;;  %s225_s0 = scalar_lea.sflag [#allocation6], %s950_s20  ;;  %s228_s10 = scalar_lea.vmem [#allocation5], %s534_s28 }
  0x44   : > { %776 = dma.done.wait (%p881_p8), %s225_s0, 256  }
  0x45   : > { %778 = vsyncadd (%p881_p8), %s225_s0, 4294967040  ;;  %s536_s4 = sshll.u32 %s950_s20, 3  ;;  %v813_v0 = vmov 0.0   ;;  %p538_p0 = scmp.ge.s32.totalorder %s801_s15, 1 }
  0x46   : > { %s964_s5 = scalar_lea.vmem [#allocation7], %s536_s4  ;;  %s967_s7 = scalar_lea.vmem [#allocation8], %s536_s4 }
  0x47   : > { %270 = vst [vmem:[%s964_s5] sm:$0xff] %v813_v0  ;;  %276 = sbr.rel (%p538_p0) target bundleno = 106 (0x6a), region = 44 }
  0x48   : > { %271 = vst [vmem:[%s967_s7] sm:$0xff] %v813_v0 }
  0x4c   : > { %v277_v1 = vld [vmem:[%s218_s6] sm:$0xff]  ;;  %v278_v2 = vld [vmem:[%s218_s6 + $0x8] sm:$0xff] }
  0x4d   : > { %v281_v3 = vsub.f32 0.0, %v277_v1  ;;  %v282_v4 = vsub.f32 0.0, %v278_v2  ;;  %v279_v11 = vld [vmem:[%s228_s10] sm:$0xff]  ;;  %v280_v12 = vld [vmem:[%s228_s10 + $0x8] sm:$0xff] }
  0x4e   : > { %v299_v19 = vld [vmem:[%s964_s5] sm:$0xff] }
  0x4f   : > { %v283_v5 = vmul.f32 1.442695, %v281_v3  ;;  %v285_v6 = vmul.f32 1.442695, %v282_v4  ;;  %v302_v20 = vld [vmem:[%s967_s7] sm:$0xff] }
  0x51   : > { %623 = vpow2.f32 %v283_v5 }
  0x52   : > { %625 = vpow2.f32 %v285_v6 }
  0x57   : > { %v624_v7 = vpop.eup %623 }
  0x58   : > { %v626_v8 = vpop.eup %625  ;;  %v287_v9 = vadd.f32 1.0, %v624_v7 }
  0x59   : > { %v288_v10 = vadd.f32 1.0, %v626_v8 }
  0x5a   : > { %627 = vrcp.f32 %v287_v9 }
  0x5b   : > { %629 = vrcp.f32 %v288_v10 }
  0x60   : > { %v628_v13 = vpop.eup %627 }
  0x61   : > { %v630_v14 = vpop.eup %629  ;;  %v291_v15 = vmul.f32 %v628_v13, %v279_v11  ;;  %v295_v16 = vadd.f32 %v628_v13, %v279_v11 }
  0x62   : > { %v292_v17 = vmul.f32 %v630_v14, %v280_v12  ;;  %v296_v18 = vadd.f32 %v630_v14, %v280_v12 }
  0x64   : > { %v293_v21 = vadd.f32 %v292_v17, %v291_v15  ;;  %v297_v22 = vadd.f32 %v296_v18, %v295_v16 }
  0x66   : > { %v300_v23 = vadd.f32 %v299_v19, %v293_v21  ;;  %v303_v24 = vadd.f32 %v302_v20, %v297_v22 }
  0x68   : > { %301 = vst [vmem:[%s964_s5] sm:$0xff] %v300_v23 }
  0x69   : > { %304 = vst [vmem:[%s967_s7] sm:$0xff] %v303_v24 }
  0x6a PF: > { %s542_s24 = sshll.u32 %s801_s15, 3  ;;  %s370_s22 = sshll.u32 %s964_s5, 4  ;;  %s371_s22 = int_to_ptr.vmem [resolvable:$true] %s370_s22 }
  0x6b   : > { %s368_s21 = scalar_lea.hbm %s1031_s2, %s542_s24  ;;  %s353_s8 = scalar_lea.sflag [#allocation4], %s950_s20 }
  0x6c   : > { %s372_s23 = sshll.u32 %s368_s21, 4  ;;  %s711_s15 = scalar_lea.hbm %s1031_s2, 16  ;;  %s373_s23 = int_to_ptr.hbm [resolvable:$true] %s372_s23 }
  0x6d   : > { %s705_s30 = sshra.s32 %s373_s23, 4  ;;  %s706_s30 = int_to_ptr.hbm [resolvable:$true] %s705_s30 }
  0x6e   : > { %s707_s9 = scalar_lea.hbm %s706_s30, 8  ;;  %p712_p10 = scmp.lt.s32.totalorder %s706_s30, %s1031_s2 }
  0x6f   : > { %p708_p8 = scmp.ne.s32.totalorder %s706_s30, %s707_s9  ;;  %p713_p13 = scmp.lt.s32.totalorder %s711_s15, %s707_s9 }
  0x71   : > { %p709_p3 = pnand %p708_p8, %p885_p9  ;;  %p714_p2 = por %p713_p13, %p712_p10 }
  0x73   : > { %p710_p7 = pneg %p709_p3 }
  0x75   : > { %p715_p5 = pnand %p714_p2, %p710_p7 }
  0x77   : > { %718 = shalt.err (!%p715_p5)
}
  0x78   : > { %552 = dma.vmem_to_hbm [thread:$0]  (%p885_p9), %s371_s22, 128, %s373_s23, %s353_s8  }
  0x79   : > { %s382_s4 = scalar_lea.hbm %s1032_s3, %s542_s24  ;;  %s384_s5 = sshll.u32 %s967_s7, 4  ;;  %s385_s5 = int_to_ptr.vmem [resolvable:$true] %s384_s5 }
  0x7a   : > { %s386_s18 = sshll.u32 %s382_s4, 4  ;;  %s358_s19 = scalar_lea.sflag [#allocation9], %s950_s20  ;;  %s387_s18 = int_to_ptr.hbm [resolvable:$true] %s386_s18 }
  0x7b   : > { %s733_s21 = sshra.s32 %s387_s18, 4  ;;  %s739_s22 = scalar_lea.hbm %s1032_s3, 16  ;;  %s734_s21 = int_to_ptr.hbm [resolvable:$true] %s733_s21 }
  0x7c   : > { %s735_s30 = scalar_lea.hbm %s734_s21, 8  ;;  %p740_p0 = scmp.lt.s32.totalorder %s734_s21, %s1032_s3 }
  0x7d   : > { %p736_p6 = scmp.ne.s32.totalorder %s734_s21, %s735_s30  ;;  %p741_p8 = scmp.lt.s32.totalorder %s739_s22, %s735_s30 }
  0x7f   : > { %p737_p1 = pnand %p736_p6, %p885_p9  ;;  %p742_p3 = por %p741_p8, %p740_p0 }
  0x81   : > { %p738_p4 = pneg %p737_p1 }
  0x83   : > { %p743_p7 = pnand %p742_p3, %p738_p4 }
  0x85   : > { %746 = shalt.err (!%p743_p7)
}
  0x86   : > { %553 = dma.vmem_to_hbm [thread:$0]  (%p885_p9), %s385_s5, 128, %s387_s18, %s358_s19  }
  0x87 PF: > { %s398_s20 = sand.u32 1, %s789_s12   ;;  %p564_p10 = pnand %p526_p12, %p892_p11 }
  0x88   : > { %s399_s7 = scalar_lea.sflag [#allocation4], %s398_s20 }
  0x89   : > { %p565_p13 = pneg %p564_p10 }
  0x8b   : > { %780 = dma.done.wait (%p565_p13), %s399_s7, 128  }
  0x8c   : > { %782 = vsyncadd (%p565_p13), %s399_s7, 4294967168  ;;  %s409_s24 = scalar_lea.sflag [#allocation9], %s398_s20 }
  0x8d   : > { %784 = dma.done.wait (%p565_p13), %s409_s24, 128  }
  0x8e   : > { %786 = vsyncadd (%p565_p13), %s409_s24, 4294967168  ;;  %s26_s17 = sadd.s32 1, %s809_s17   ;;  %s1043_s25 = sld [smem:[#allocation14_spill]] }
  0x8f   : > { %p23_p2 = scmp.ge.s32.totalorder %s26_s17, 4   ;;  %s1044_s12 = smov %s793_s13 }
  0x90   : > { %s1045_s13 = smov %s797_s14  ;;  %s1046_s14 = smov %s890_s26 }
  0x91   : > { %s1047_s15 = smov %s805_s16  ;;  %25 = sbr.rel (!%p23_p2) target bundleno = 12 (0xc), region = 115 }
  0x94   : > { %s1048_s16 = smov %s1043_s25 }
  0x96   :  { %415 = vsyncpa [#allocation3], 1 }
  0x97   :  { %417 = vsyncpa [#allocation3 + $0x1], 1 }
  0x98   :  { %418 = vsyncpa [#allocation6], 1 }
  0x99   :  { %420 = vsyncpa [#allocation6 + $0x1], 1 }
  0x9a   :  { %421 = vsyncpa [#allocation4], 1 }
  0x9b   :  { %423 = vsyncpa [#allocation4 + $0x1], 1 }
  0x9c   :  { %424 = vsyncpa [#allocation9], 1 }
  0x9d   :  { %426 = vsyncpa [#allocation9 + $0x1], 1 }

</bundles_post_ra>
